<compile_context>
chip_gen: v7x
topology: tpu7x:2x2x1
jax: 0.10.0
libtpu: 0.0.40
codegen_flags: <defaults>
</compile_context>

<pallas_src>
import functools

import jax
import jax.numpy as jnp
from jax.experimental import pallas as pl
from jax.experimental.pallas import tpu as pltpu


# ---------------------------------------------------------------------------
# Style path: Conv1d(256->1, k=1) + Linear(att_dim -> 2*C), one batch per step.
# ---------------------------------------------------------------------------
def style_kernel(s_ref, cw_ref, cb_ref, fw_ref, fb_ref, o_ref):
    # s_ref : (1, A, K)  style input, pre-transposed so the 256 conv channels
    #                    (K) sit on the lane axis.
    # cw_ref: (1, K)     Conv1d weight (out=1, k=1) as a row.
    # cb_ref: (1, 1)     Conv1d bias.
    # fw_ref: (A, 2C)    Linear weight pre-transposed to (in, out).
    # fb_ref: (1, 2C)    Linear bias.
    s = s_ref[0].astype(jnp.float32)                       # (A, K)
    cw = cw_ref[...].astype(jnp.float32)                   # (1, K)
    # Conv1d with kernel_size=1 == weighted sum over the 256 input channels.
    h = jnp.sum(s * cw, axis=1, keepdims=True)             # (A, 1)
    h = h + cb_ref[...].astype(jnp.float32)
    # Linear: st[j] = sum_a h[a] * fw[a, j]
    fw = fw_ref[...].astype(jnp.float32)                   # (A, 2C)
    st = jnp.sum(fw * h, axis=0, keepdims=True)            # (1, 2C)
    st = st + fb_ref[...].astype(jnp.float32)
    o_ref[0] = st.astype(o_ref.dtype)


# ---------------------------------------------------------------------------
# Instance-norm + AdaIN modulation over rows = B*C, lanes = H*W.
# ---------------------------------------------------------------------------
def inorm_mod_kernel(x_ref, scale_ref, shift_ref, o_ref, *, eps):
    x = x_ref[...].astype(jnp.float32)                     # (tm, HW)
    mean = jnp.mean(x, axis=-1, keepdims=True)
    xc = x - mean
    var = jnp.mean(xc * xc, axis=-1, keepdims=True)
    xn = xc * jax.lax.rsqrt(var + eps)                     # rsqrt -> EUP
    out = xn * scale_ref[...] + shift_ref[...]             # (tm,1) bcast on lanes
    o_ref[...] = out.astype(o_ref.dtype)


def adain(x, s, conv_w, conv_b, fc_w, fc_b, *, eps=1e-5, tm=256):
    """AdaIN forward.

    x      : (B, C, H, W)   content features
    s      : (B, 256, A)    style features (A = att_dim)
    conv_w : (256,)         Conv1d(256, 1, k=1) weight (== torch weight[0, :, 0])
    conv_b : (1,)           Conv1d bias
    fc_w   : (A, 2C)        Linear weight, pre-transposed (torch weight.T)
    fc_b   : (2C,)          Linear bias
    """
    B, C, H, W = x.shape
    Bs, K, A = s.shape
    assert Bs == B
    two_c = fc_w.shape[1]
    assert two_c == 2 * C
    HW = H * W
    rows = B * C

    # ---- style kernel: per-batch (1+gamma, beta) ---------------------------
    s_t = jnp.transpose(s, (0, 2, 1))                # (B, A, K): K on lanes
    cw2 = conv_w.reshape(1, K)
    cb2 = conv_b.reshape(1, 1)
    fb2 = fc_b.reshape(1, two_c)

    style = pl.pallas_call(
        style_kernel,
        out_shape=jax.ShapeDtypeStruct((B, 1, two_c), jnp.float32),
        grid_spec=pltpu.PrefetchScalarGridSpec(
            num_scalar_prefetch=0,
            grid=(B,),
            in_specs=[
                pl.BlockSpec((1, A, K), lambda b: (b, 0, 0)),
                pl.BlockSpec((1, K), lambda b: (0, 0)),
                pl.BlockSpec((1, 1), lambda b: (0, 0)),
                pl.BlockSpec((A, two_c), lambda b: (0, 0)),
                pl.BlockSpec((1, two_c), lambda b: (0, 0)),
            ],
            out_specs=pl.BlockSpec((1, 1, two_c), lambda b: (b, 0, 0)),
        ),
        compiler_params=pltpu.CompilerParams(
            dimension_semantics=("parallel",)),
    )(s_t, cw2, cb2, fc_w, fb2)

    style = style.reshape(B, two_c)
    scale = (1.0 + style[:, :C]).reshape(rows, 1)    # (B*C, 1) = 1 + gamma
    shift = style[:, C:].reshape(rows, 1)            # (B*C, 1) = beta

    # ---- norm + modulation kernel ------------------------------------------
    x2 = x.reshape(rows, HW)                         # contiguous, lane-dense

    if rows <= tm:
        tm_eff = rows                                # full-extent block (legal)
    else:
        tm_eff = tm                                  # multiple of 8
        # keep double-buffered in/out tiles (+ f32 temps) within ~48 MiB
        while tm_eff > 8 and 6 * tm_eff * HW * 4 > (48 << 20):
            tm_eff //= 2

    rows_p = pl.cdiv(rows, tm_eff) * tm_eff
    if rows_p != rows:
        pad = rows_p - rows
        x2 = jnp.pad(x2, ((0, pad), (0, 0)))
        scale = jnp.pad(scale, ((0, pad), (0, 0)))
        shift = jnp.pad(shift, ((0, pad), (0, 0)))

    tile_bytes = tm_eff * HW * 4
    vmem_limit = int(min(max(6 * tile_bytes + (2 << 20), 32 << 20), 56 << 20))

    out = pl.pallas_call(
        functools.partial(inorm_mod_kernel, eps=eps),
        out_shape=jax.ShapeDtypeStruct((rows_p, HW), x.dtype),
        grid_spec=pltpu.PrefetchScalarGridSpec(
            num_scalar_prefetch=0,
            grid=(rows_p // tm_eff,),
            in_specs=[
                pl.BlockSpec((tm_eff, HW), lambda i: (i, 0)),
                pl.BlockSpec((tm_eff, 1), lambda i: (i, 0)),
                pl.BlockSpec((tm_eff, 1), lambda i: (i, 0)),
            ],
            out_specs=pl.BlockSpec((tm_eff, HW), lambda i: (i, 0)),
        ),
        compiler_params=pltpu.CompilerParams(
            dimension_semantics=("parallel",),
            vmem_limit_bytes=vmem_limit),
    )(x2, scale, shift)

    return out[:rows].reshape(B, C, H, W)


def reference(x, s, conv_w, conv_b, fc_w, fc_b, eps=1e-5):
    B, C, H, W = x.shape
    hp = jax.lax.Precision.HIGHEST
    h = jnp.einsum("bkt,k->bt", s, conv_w, precision=hp) + conv_b
    st = jnp.dot(h, fc_w, precision=hp) + fc_b
    gamma = st[:, :C][:, :, None, None]
    beta = st[:, C:][:, :, None, None]
    mean = x.mean(axis=(2, 3), keepdims=True)
    var = ((x - mean) ** 2).mean(axis=(2, 3), keepdims=True)
    xn = (x - mean) * jax.lax.rsqrt(var + eps)
    return (1.0 + gamma) * xn + beta


if __name__ == "__main__":
    # Small shapes: batch=2, num_features C=4, spatial 16x16, att_dim=32.
    # Conv1d in-channels are fixed to 256 by the module definition.
    B, C, H, W = 2, 4, 16, 16
    K, A = 256, 32

    key = jax.random.PRNGKey(0)
    kx, ks, k1, k2, k3, k4 = jax.random.split(key, 6)

    x = jax.random.normal(kx, (B, C, H, W), dtype=jnp.float32)
    s = jax.random.normal(ks, (B, K, A), dtype=jnp.float32)

    conv_w = jax.random.normal(k1, (K,), dtype=jnp.float32) * (1.0 / K ** 0.5)
    conv_b = jax.random.normal(k2, (1,), dtype=jnp.float32) * 0.01
    fc_w = jax.random.normal(k3, (A, 2 * C), dtype=jnp.float32) * (1.0 / A ** 0.5)
    fc_b = jax.random.normal(k4, (2 * C,), dtype=jnp.float32) * 0.01

    out = adain(x, s, conv_w, conv_b, fc_w, fc_b)
    out = jax.block_until_ready(out)

    ref = reference(x, s, conv_w, conv_b, fc_w, fc_b)
    assert out.shape == (B, C, H, W)
    assert jnp.allclose(out, ref, atol=1e-4, rtol=1e-4), float(
        jnp.max(jnp.abs(out - ref)))

    print("KERNEL_OK")
</pallas_src>

<mosaic_0001>
module attributes {stable_mosaic.version = 11 : i64} {
  func.func @style_kernel(%arg0: i32, %arg1: memref<1x32x256xf32, #tpu.memory_space<vmem>>, %arg2: memref<1x256xf32, #tpu.memory_space<vmem>>, %arg3: memref<1x1xf32, #tpu.memory_space<vmem>>, %arg4: memref<32x8xf32, #tpu.memory_space<vmem>>, %arg5: memref<1x8xf32, #tpu.memory_space<vmem>>, %arg6: memref<1x1x8xf32, #tpu.memory_space<vmem>>) attributes {dimension_semantics = [#tpu.dimension_semantics<parallel>], iteration_bounds = array<i64: 2>, scalar_prefetch = 0 : i64, scratch_operands = 0 : i64, tpu.core_type = #tpu.core_type<tc>, window_params = [{transform_indices = @transform_0, window_bounds = array<i64: 1, 32, 256>}, {pipeline_mode = #tpu.pipeline_mode<synchronous>, transform_indices = @transform_1, window_bounds = array<i64: 1, 256>}, {pipeline_mode = #tpu.pipeline_mode<synchronous>, transform_indices = @transform_2, window_bounds = array<i64: 1, 1>}, {pipeline_mode = #tpu.pipeline_mode<synchronous>, transform_indices = @transform_3, window_bounds = array<i64: 32, 8>}, {pipeline_mode = #tpu.pipeline_mode<synchronous>, transform_indices = @transform_4, window_bounds = array<i64: 1, 8>}, {transform_indices = @transform_5, window_bounds = array<i64: 1, 1, 8>}]} {
    %c0 = arith.constant 0 : index
    %c0_0 = arith.constant 0 : index
    %c0_1 = arith.constant 0 : index
    %0 = vector.load %arg1[%c0, %c0_0, %c0_1] : memref<1x32x256xf32, #tpu.memory_space<vmem>>, vector<1x32x256xf32>
    %1 = vector.shape_cast %0 : vector<1x32x256xf32> to vector<32x256xf32>
    %c0_2 = arith.constant 0 : index
    %c0_3 = arith.constant 0 : index
    %2 = vector.load %arg2[%c0_2, %c0_3] : memref<1x256xf32, #tpu.memory_space<vmem>>, vector<1x256xf32>
    %3 = vector.broadcast %2 : vector<1x256xf32> to vector<32x256xf32>
    %4 = arith.mulf %1, %3 : vector<32x256xf32>
    %cst = arith.constant dense<0.000000e+00> : vector<32xf32>
    %5 = vector.multi_reduction <add>, %4, %cst [1] : vector<32x256xf32> to vector<32xf32>
    %6 = vector.shape_cast %5 : vector<32xf32> to vector<32x1xf32>
    %c0_4 = arith.constant 0 : index
    %c0_5 = arith.constant 0 : index
    %7 = vector.load %arg3[%c0_4, %c0_5] : memref<1x1xf32, #tpu.memory_space<vmem>>, vector<1x1xf32>
    %8 = vector.broadcast %7 : vector<1x1xf32> to vector<32x1xf32>
    %9 = arith.addf %6, %8 : vector<32x1xf32>
    %c0_6 = arith.constant 0 : index
    %c0_7 = arith.constant 0 : index
    %10 = vector.load %arg4[%c0_6, %c0_7] : memref<32x8xf32, #tpu.memory_space<vmem>>, vector<32x8xf32>
    %11 = vector.broadcast %9 : vector<32x1xf32> to vector<32x8xf32>
    %12 = arith.mulf %10, %11 : vector<32x8xf32>
    %cst_8 = arith.constant dense<0.000000e+00> : vector<8xf32>
    %13 = vector.multi_reduction <add>, %12, %cst_8 [0] : vector<32x8xf32> to vector<8xf32>
    %14 = vector.shape_cast %13 : vector<8xf32> to vector<1x8xf32>
    %c0_9 = arith.constant 0 : index
    %c0_10 = arith.constant 0 : index
    %15 = vector.load %arg5[%c0_9, %c0_10] : memref<1x8xf32, #tpu.memory_space<vmem>>, vector<1x8xf32>
    %16 = arith.addf %14, %15 : vector<1x8xf32>
    %c0_11 = arith.constant 0 : index
    %c0_12 = arith.constant 0 : index
    %c0_13 = arith.constant 0 : index
    %17 = vector.load %arg6[%c0_11, %c0_12, %c0_13] : memref<1x1x8xf32, #tpu.memory_space<vmem>>, vector<1x1x8xf32>
    %18 = vector.shape_cast %17 : vector<1x1x8xf32> to vector<1x8xf32>
    %19 = vector.shape_cast %16 : vector<1x8xf32> to vector<1x1x8xf32>
    tpu.vector_store %arg6[%c0_11, %c0_12, %c0_13], %19 {strides = array<i32>} : memref<1x1x8xf32, #tpu.memory_space<vmem>>, vector<1x1x8xf32>,
    return
  }
  func.func @transform_0(%arg0: i32) -> (i32, i32, i32) {
    %c0_i32 = arith.constant 0 : i32
    %c0_i32_0 = arith.constant 0 : i32
    %c0_i32_1 = arith.constant 0 : i32
    return %arg0, %c0_i32, %c0_i32_0 : i32, i32, i32
  }
  func.func @transform_1(%arg0: i32) -> (i32, i32) {
    %c0_i32 = arith.constant 0 : i32
    %c0_i32_0 = arith.constant 0 : i32
    %c0_i32_1 = arith.constant 0 : i32
    return %c0_i32, %c0_i32_0 : i32, i32
  }
  func.func @transform_2(%arg0: i32) -> (i32, i32) {
    %c0_i32 = arith.constant 0 : i32
    %c0_i32_0 = arith.constant 0 : i32
    %c0_i32_1 = arith.constant 0 : i32
    return %c0_i32, %c0_i32_0 : i32, i32
  }
  func.func @transform_3(%arg0: i32) -> (i32, i32) {
    %c0_i32 = arith.constant 0 : i32
    %c0_i32_0 = arith.constant 0 : i32
    %c0_i32_1 = arith.constant 0 : i32
    return %c0_i32, %c0_i32_0 : i32, i32
  }
  func.func @transform_4(%arg0: i32) -> (i32, i32) {
    %c0_i32 = arith.constant 0 : i32
    %c0_i32_0 = arith.constant 0 : i32
    %c0_i32_1 = arith.constant 0 : i32
    return %c0_i32, %c0_i32_0 : i32, i32
  }
  func.func @transform_5(%arg0: i32) -> (i32, i32, i32) {
    %c0_i32 = arith.constant 0 : i32
    %c0_i32_0 = arith.constant 0 : i32
    %c0_i32_1 = arith.constant 0 : i32
    return %arg0, %c0_i32, %c0_i32_0 : i32, i32, i32
  }
}

</mosaic_0001>

<bundles_post_ra>
// kernel: tpu_custom_call.1
= control target key start
LH: loop header
LB: loop body
LE: loop exit
PB: predicated region body
PF: predicated region fallthrough
CT: control target
= control target key end

     0   :  { %s799_s0 = inlined_call_operand.hbm [shape: f32[2,32,256], index: 0, kind: input, shape index: {}]   ;;  %s800_s1 = inlined_call_operand.vmem [shape: f32[1,256], index: 1, kind: input, shape index: {}]   ;;  %s801_s2 = inlined_call_operand.<no memory space> [shape: f32[1,1], index: 2, kind: input, shape index: {}]   ;;  %s802_s3 = inlined_call_operand.vmem [shape: f32[32,8], index: 3, kind: input, shape index: {}]   ;;  %s803_s4 = inlined_call_operand.vmem [shape: f32[1,8], index: 4, kind: input, shape index: {}]   ;;  %s804_s5 = inlined_call_operand.hbm [shape: f32[2,1,8], index: 5, kind: output, shape index: {}]  }
   0x1   :  { %v10_v0 = vstv %s801_s2 }
   0x2   :  { %11 = vst [vmem:[#allocation2] sm:$0x1] %v10_v0 }
   0x3   :  { %12 = vsyncpa [#allocation4], 0 }
   0x4   :  { %14 = vsyncpa [#allocation4 + $0x1], 0 }
   0x5   :  { %15 = vsyncpa [#allocation5], 0 }
   0x6   :  { %17 = vsyncpa [#allocation5 + $0x1], 0  ;;  %s620_s20 = smov 0   ;;  %s622_s21 = smov 0  }
   0x7   :  { %s624_s22 = smov 0   ;;  %s626_s23 = smov 0  }
   0x8 LB: > { %s641_s2 = sadd.s32 4294967295, %s580_s23   ;;  %s420_s24 = sadd.s32 4294967294, %s580_s23   ;;  %s580_s23 = sphi %s626_s23, %s817_s23   ;;  %s576_s22 = sphi %s624_s22, %s816_s22   ;;  %s572_s21 = sphi %s622_s21, %s815_s21   ;;  %s568_s20 = sphi %s620_s20, %s814_s20  }
   0x9   : > { %s645_s25 = sadd.s32 1, %s580_s23   ;;  %s30_s26 = sadd.s32 1, %s576_s22 }
   0xa   : > { %s27_s27 = ssub.s32 %s580_s23, %s645_s25  ;;  %p37_p0 = scmp.ne.s32.totalorder %s576_s22, %s572_s21 }
   0xb   : > { %p28_p1 = scmp.eq.s32.totalorder %s27_s27, 0  ;;  %p38_p2 = scmp.eq.s32.totalorder %s580_s23, 0 }
   0xc   : > { %p43_p3 = scmp.ne.s32.totalorder %s572_s21, %s568_s20  ;;  %p44_p4 = scmp.eq.s32.totalorder %s641_s2, 0 }
   0xd   : > { %s657_s28 = scalar_select %p28_p1, %s576_s22, %s30_s26  }
   0xe   : > { %p659_p5 = por %p38_p2, %p37_p0  ;;  %p663_p6 = por %p44_p4, %p43_p3 }
   0xf   : > { %p151_p7 = scmp.eq.s32.totalorder %s641_s2, 1  ;;  %p157_p8 = scmp.eq.s32.totalorder %s420_s24, 1 }
  0x10   : > { %p445_p10 = scmp.lt.s32.totalorder %s580_s23, 2  ;;  %s189_s8 = sand.u32 1, %s576_s22  }
  0x11   : > { %p670_p11 = por %p151_p7, %p37_p0  ;;  %p674_p12 = por %p157_p8, %p43_p3 }
  0x12   : > { %s432_s9 = sshll.u32 %s580_s23, 10  ;;  %s423_s10 = sshll.u32 %s189_s8, 6 }
  0x13   : > { %s808_s6 = scalar_select %p670_p11, 1, 0 }
  0x14   : > { %s809_s7 = scalar_select %p674_p12, 1, 0 }
  0x15   : > { %s683_s13 = scalar_lea.hbm %s799_s0, %s432_s9  ;;  %s193_s14 = scalar_lea.vmem [#allocation3], %s423_s10 }
  0x16   : > { %s200_s15 = sshll.u32 %s193_s14, 4  ;;  %p687_p13 = pnand %p445_p10, %p659_p5  ;;  %s691_s15 = int_to_ptr.vmem [resolvable:$true] %s200_s15 }
  0x17   : > { %s693_s17 = scalar_lea.sflag [#allocation4], %s189_s8  ;;  %s484_s18 = scalar_lea.hbm %s683_s13, 1024 }
  0x18   : > { %p485_p0 = scmp.ne.s32.totalorder %s683_s13, %s484_s18  ;;  %p486_p1 = pneg %p687_p13 }
  0x19   : > { %s489_s26 = scalar_lea.hbm %s799_s0, 2048  ;;  %p490_p4 = scmp.lt.u32.totalorder %s683_s13, %s799_s0 }
  0x1a   : > { %p487_p2 = pnand %p486_p1, %p485_p0  ;;  %p491_p5 = scmp.lt.u32.totalorder %s489_s26, %s484_s18 }
  0x1b   : > { %p493_p8 = scmp.lt.u32.totalorder %s484_s18, %s683_s13 }
  0x1c   : > { %p488_p3 = pneg %p487_p2  ;;  %p492_p7 = por %p491_p5, %p490_p4 }
  0x1e   : > { %p494_p10 = por %p493_p8, %p492_p7 }
  0x20   : > { %p495_p9 = pnand %p494_p10, %p488_p3 }
  0x22   : > { %498 = shalt.err (!%p495_p9)
}
  0x23   : > { %s499_s8 = scalar_lea.vmem %s691_s15, 1024  ;;  %s582_s9 = smov [#allocation3]  }
  0x24   : > { %p500_p0 = scmp.ne.s32.totalorder %s691_s15, %s499_s8  ;;  %s504_s10 = sshll.u32 %s582_s9, 4  ;;  %s505_s10 = int_to_ptr.vmem [resolvable:$false] %s504_s10 }
  0x25   : > { %s506_s11 = scalar_lea.vmem %s505_s10, 2048  ;;  %p507_p11 = scmp.lt.s32.totalorder %s691_s15, %s505_s10 }
  0x26   : > { %p502_p2 = pnand %p500_p0, %p486_p1  ;;  %p508_p4 = scmp.lt.s32.totalorder %s506_s11, %s499_s8 }
  0x28   : > { %p503_p12 = pneg %p502_p2  ;;  %p509_p5 = por %p508_p4, %p507_p11 }
  0x2a   : > { %p510_p7 = pnand %p509_p5, %p503_p12 }
  0x2c   : > { %513 = shalt.err (!%p510_p7)
}
  0x2d   : > { %s583_s12 = smov 256   ;;  %s584_s14 = smov 16  }
  0x2e   : > { %440 = dma.hbm_to_vmem [thread:$0]  (!%p687_p13), %s683_s13, 1024, %s691_s15, %s693_s17, %s583_s12, %s583_s12, %s584_s14  }
  0x2f   : > { %p426_p9 = scmp.ge.s32.totalorder %s580_s23, 1  ;;  %p208_p1 = scmp.lt.s32.totalorder %s580_s23, 3 }
  0x31   : > { %p209_p3 = pnand %p426_p9, %p208_p1 }
  0x32   : > { %s724_s18 = sand.u32 (!%p209_p3), 1, %s572_s21  }
  0x33   : > { %212 = sbr.rel (%p209_p3) target bundleno = 388 (0x184), region = 40  ;;  %s427_s19 = sshll.u32 (!%p209_p3), %s724_s18, 6 }
  0x34   : > { %s215_s24 = scalar_lea.sflag (!%p209_p3), [#allocation4], %s724_s18  ;;  %s218_s26 = scalar_lea.vmem (!%p209_p3), [#allocation3], %s427_s19 }
  0x3a   : > { %559 = dma.done.wait (%p663_p6), %s215_s24, 1024  }
  0x3b   : > { %561 = vsyncadd (%p663_p6), %s215_s24, 4294966272  ;;  %v254_v1 = vlaneseq  ;;  %v244_v5 = vld [vmem:[%s218_s26] sm:$0xff]  ;;  %v245_v6 = vld [vmem:[%s218_s26 + $0x8] sm:$0xff]  ;;  %v585_v28 = vmov 0   ;;  %vm323_vm0 = vcmask 64512   ;;  %s429_s14 = sshll.u32 %s641_s2, 4 }
  0x3c   : > { %v252_v7 = vld [vmem:[%s800_s1] sm:$0x3]  ;;  %v246_v10 = vld [vmem:[%s218_s26 + $0x10] sm:$0xff]  ;;  %v249_v13 = vld [vmem:[%s218_s26 + $0x28] sm:$0xff]  ;;  %482 = vset.pattern.permute.xlu0 %v585_v28  ;;  %483 = vset.pattern.permute.xlu1 %v585_v28  ;;  %s243_s19 = scalar_lea.vmem [#allocation6], %s724_s18  ;;  %vm339_vm1 = vcmask 57344   ;;  %s755_s15 = scalar_lea.hbm %s804_s5, %s429_s14 }
  0x3d   : > { %v255_v2 = vshrl.u32 %v254_v1, 7  ;;  %v247_v11 = vld [vmem:[%s218_s26 + $0x18] sm:$0xff]  ;;  %v248_v12 = vld [vmem:[%s218_s26 + $0x20] sm:$0xff]  ;;  %v250_v14 = vld [vmem:[%s218_s26 + $0x30] sm:$0xff]  ;;  %s354_s24 = sshll.u32 %s243_s19, 4  ;;  %s342_s30 = scalar_lea.sflag [#allocation5], %s724_s18  ;;  %s757_s24 = int_to_ptr.vmem [resolvable:$true] %s354_s24 }
  0x3e   : > { %v251_v15 = vld [vmem:[%s218_s26 + $0x38] sm:$0xff]  ;;  %v296_v38 = vld [vmem:[%s802_s3 + $0x8] sm:$0xff]  ;;  %v297_v43 = vld [vmem:[%s802_s3 + $0x10] sm:$0xff]  ;;  %s514_s16 = scalar_lea.vmem %s757_s24, 16  ;;  %p811_p11 = scmp.ne.s32.totalorder %s808_s6, 0 }
  0x3f   : > { %v256_v3 = vsub.s32 0, %v255_v2  ;;  %v260_v4 = vsub.s32 1, %v255_v2  ;;  %v428_v29 = vld [vmem:[#allocation2] ss:$0 sm:$0xff]  ;;  %v298_v48 = vld [vmem:[%s802_s3 + $0x18] sm:$0xff]  ;;  %p515_p6 = scmp.ne.s32.totalorder %s757_s24, %s514_s16  ;;  %s586_s2 = smov [#allocation6]  }
  0x40   : > { %v295_v39 = vld [vmem:[%s802_s3] sm:$0xff]  ;;  %s518_s17 = sshll.u32 %s586_s2, 4  ;;  %s519_s17 = int_to_ptr.vmem [resolvable:$false] %s518_s17 }
  0x41   : > { %v257_v8 = vrot.slane %v252_v7, %v256_v3  ;;  %v261_v9 = vrot.slane %v252_v7, %v260_v4  ;;  %v337_v62 = vld [vmem:[%s803_s4] sm:$0x1]  ;;  %p516_p12 = pnand %p515_p6, %p811_p11  ;;  %s520_s27 = scalar_lea.vmem %s519_s17, 32 }
  0x42   : > { %p521_p8 = scmp.lt.s32.totalorder %s757_s24, %s519_s17  ;;  %p522_p10 = scmp.lt.s32.totalorder %s520_s27, %s514_s16 }
  0x43   : > { %v264_v16 = vmul.f32 %v257_v8, %v244_v5  ;;  %v265_v17 = vmul.f32 %v261_v9, %v245_v6  ;;  %v266_v18 = vmul.f32 %v257_v8, %v246_v10  ;;  %v267_v19 = vmul.f32 %v261_v9, %v247_v11  ;;  %p517_p13 = pneg %p516_p12 }
  0x44   : > { %v268_v20 = vmul.f32 %v257_v8, %v248_v12  ;;  %v269_v21 = vmul.f32 %v261_v9, %v249_v13  ;;  %v270_v22 = vmul.f32 %v257_v8, %v250_v14  ;;  %v271_v23 = vmul.f32 %v261_v9, %v251_v15  ;;  %p523_p0 = por %p522_p10, %p521_p8 }
  0x45   : > { %v272_v24 = vadd.f32 %v265_v17, %v264_v16  ;;  %v275_v26 = vadd.f32 %v267_v19, %v266_v18 }
  0x46   : > { %v278_v25 = vadd.f32 %v269_v21, %v268_v20  ;;  %v281_v27 = vadd.f32 %v271_v23, %v270_v22  ;;  %p524_p2 = pnand %p523_p0, %p517_p13 }
  0x47   : > { %273 = vadd.xlane.f32.xlu0 %v272_v24 }
  0x48   : > { %279 = vadd.xlane.f32.xlu1 %v278_v25 }
  0x4b   : > { %276 = vadd.xlane.f32.xlu0 %v275_v26 }
  0x4c   : > { %282 = vadd.xlane.f32.xlu1 %v281_v27 }
  0xd4   : > { %v274_v30 = vpop.xlane.xlu0 %273 }
  0xd5   : > { %v291_v31 = vadd.f32 %v428_v29, %v274_v30  ;;  %v280_v32 = vpop.xlane.xlu1 %279 }
  0xd6   : > { %v293_v35 = vadd.f32 %v428_v29, %v280_v32 }
  0xd7   : > { %301 = vperm.xlu0 %482, %v291_v31  }
  0xd8   : > { %v277_v33 = vpop.xlane.xlu0 %276 }
  0xd9   : > { %v292_v34 = vadd.f32 %v428_v29, %v277_v33  ;;  %v283_v36 = vpop.xlane.xlu1 %282 }
  0xda   : > { %v294_v37 = vadd.f32 %v428_v29, %v283_v36 }
  0xdb   : > { %306 = vperm.xlu1 %483, %v292_v34  }
  0xdf   : > { %311 = vperm.xlu1 %483, %v293_v35  }
  0xe3   : > { %316 = vperm.xlu1 %483, %v294_v37  }
 0x156   : > { %v302_v40 = vpop.permute.xlu0 %301 }
 0x157   : > { %v319_v44 = vmul.f32 %v302_v40, %v295_v39 }
 0x159   : > { %v324_v49 = vsel %vm323_vm0, %v319_v44, 0.0 }
 0x15a   : > { %v307_v41 = vpop.permute.xlu1 %306 }
 0x15b   : > { %v320_v42 = vmul.f32 %v307_v41, %v296_v38 }
 0x15d   : > { %v325_v46 = vsel %vm323_vm0, %v320_v42, 0.0 }
 0x15e   : > { %v312_v45 = vpop.permute.xlu1 %311  ;;  %v326_v51 = vadd.f32 %v325_v46, %v324_v49 }
 0x15f   : > { %v321_v47 = vmul.f32 %v312_v45, %v297_v43 }
 0x161   : > { %v327_v50 = vsel %vm323_vm0, %v321_v47, 0.0 }
 0x162   : > { %v317_v52 = vpop.permute.xlu1 %316  ;;  %v328_v54 = vadd.f32 %v327_v50, %v326_v51 }
 0x163   : > { %v322_v53 = vmul.f32 %v317_v52, %v298_v48 }
 0x165   : > { %v329_v55 = vsel %vm323_vm0, %v322_v53, 0.0 }
 0x166   : > { %v330_v56 = vadd.f32 %v329_v55, %v328_v54 }
 0x168   : > { %v331_v57 = vrot.slane %v330_v56, 4 }
 0x16a   : > { %v332_v58 = vadd.f32 %v331_v57, %v330_v56 }
 0x16c   : > { %v333_v59 = vrot.slane %v332_v58, 2 }
 0x16e   : > { %v334_v60 = vadd.f32 %v333_v59, %v332_v58 }
 0x170   : > { %v335_v61 = vrot.slane %v334_v60, 1 }
 0x172   : > { %v336_v63 = vadd.f32 %v335_v61, %v334_v60 }
 0x174   : > { %v338_v0 = vadd.f32 %v337_v62, %v336_v63 }
 0x176   : > { %340 = vst.msk [vmem:[%s243_s19] sm:$0x1] %vm339_vm1, %v338_v0 }
 0x177   : > { %527 = shalt.err (!%p524_p2)
}
 0x178   : > { %s528_s18 = scalar_lea.hbm %s755_s15, 16  ;;  %s532_s9 = scalar_lea.hbm %s804_s5, 32 }
 0x179   : > { %p529_p4 = scmp.ne.s32.totalorder %s755_s15, %s528_s18  ;;  %p533_p9 = scmp.lt.u32.totalorder %s755_s15, %s804_s5 }
 0x17a   : > { %p534_p1 = scmp.lt.u32.totalorder %s532_s9, %s528_s18  ;;  %p536_p6 = scmp.lt.u32.totalorder %s528_s18, %s755_s15 }
 0x17b   : > { %p530_p5 = pnand %p529_p4, %p811_p11 }
 0x17c   : > { %p535_p3 = por %p534_p1, %p533_p9 }
 0x17d   : > { %p531_p7 = pneg %p530_p5 }
 0x17e   : > { %p537_p12 = por %p536_p6, %p535_p3 }
 0x180   : > { %p538_p13 = pnand %p537_p12, %p531_p7 }
 0x182   : > { %541 = shalt.err (!%p538_p13)
}
 0x183   : > { %435 = dma.vmem_to_hbm [thread:$0]  (%p811_p11), %s757_s24, 16, %s755_s15, %s342_s30  }
 0x184 PF: > { %s366_s12 = sand.u32 1, %s568_s20   ;;  %p812_p8 = scmp.ne.s32.totalorder %s809_s7, 0 }
 0x185   : > { %p813_p10 = scmp.ge.s32.totalorder %s580_s23, 2  ;;  %s367_s14 = scalar_lea.sflag [#allocation5], %s366_s12 }
 0x187   : > { %p442_p0 = pnand %p813_p10, %p812_p8 }
 0x189   : > { %563 = dma.done.wait (!%p442_p0), %s367_s14, 16  }
 0x18a   : > { %565 = vsyncadd (!%p442_p0), %s367_s14, 4294967280  ;;  %p20_p2 = scmp.ge.s32.totalorder %s645_s25, 4   ;;  %s814_s20 = smov %s572_s21 }
 0x18b   : > { %s815_s21 = smov %s576_s22  ;;  %s816_s22 = smov %s657_s28 }
 0x18c   : > { %s817_s23 = smov %s645_s25  ;;  %22 = sbr.rel (!%p20_p2) target bundleno = 8 (0x8), region = 85 }
 0x193   :  { %371 = vsyncpa [#allocation4], 1 }
 0x194   :  { %373 = vsyncpa [#allocation4 + $0x1], 1 }
 0x195   :  { %374 = vsyncpa [#allocation5], 1 }
 0x196   :  { %376 = vsyncpa [#allocation5 + $0x1], 1 }

</bundles_post_ra>
